<compile_context>
chip_gen: v5e
topology: v5e:2x2
jax: 0.10.0
libtpu: 0.0.40
codegen_flags: <defaults>
</compile_context>

<pallas_src>
import functools

import jax
import jax.numpy as jnp
from jax.experimental import pallas as pl
from jax.experimental.pallas import tpu as pltpu


def _round_up(x, m):
    return (x + m - 1) // m * m


# --------------------------------------------------------------------------
# Kernel
# --------------------------------------------------------------------------
def generator_kernel(x_ref, w1_ref, b1_ref, w2_ref, b2_ref, o_ref, *, alpha):
    # ---- fc1 (bf16 MXU, f32 acc) + bias + leaky_relu (f32 VPU) ------------
    h = jnp.dot(x_ref[...], w1_ref[...], preferred_element_type=jnp.float32)
    h = h + b1_ref[...]                      # (TB, Hp) + (1, Hp) broadcast
    h = jnp.maximum(h, alpha * h)            # leaky_relu, valid for alpha in (0, 1)

    # ---- fc2 (bf16 MXU, f32 acc) + bias + tanh (f32 EUP) ------------------
    y = jnp.dot(h.astype(w2_ref.dtype), w2_ref[...],
                preferred_element_type=jnp.float32)
    y = y + b2_ref[...]                      # (TB, Op) + (1, Op) broadcast
    o_ref[...] = jnp.tanh(y).astype(o_ref.dtype)


# --------------------------------------------------------------------------
# One-time parameter preparation (hoisted out of the per-call path)
# --------------------------------------------------------------------------
def prepare_generator_params(w1, b1, w2, b2, compute_dtype=jnp.bfloat16):
    """Pad weights/biases lane-dense (multiples of 128) and cast ONCE at init.

    w1: (D_in, H), b1: (H,), w2: (H, D_out), b2: (D_out,) -- (in, out) layout,
    i.e. the transpose of torch.nn.Linear's (out, in) weight.
    Zero bias padding is required so padded hidden columns stay zero through fc2.
    """
    D_in, H = w1.shape
    D_out = w2.shape[1]
    D_in_p, H_p, D_out_p = (_round_up(d, 128) for d in (D_in, H, D_out))
    f32 = jnp.float32

    w1_p = jnp.zeros((D_in_p, H_p), compute_dtype).at[:D_in, :H].set(
        w1.astype(compute_dtype))
    b1_p = jnp.zeros((1, H_p), f32).at[0, :H].set(b1.astype(f32))
    w2_p = jnp.zeros((H_p, D_out_p), compute_dtype).at[:H, :D_out].set(
        w2.astype(compute_dtype))
    b2_p = jnp.zeros((1, D_out_p), f32).at[0, :D_out].set(b2.astype(f32))
    return (w1_p, b1_p, w2_p, b2_p), (D_in, H, D_out)


def _choose_batch_tile(B, tb_max=256):
    """Pick (tb, grid) so padding waste is <8 rows per tile and the grid has an
    even number of >=2 steps whenever B > 8 (lets v7x's 2 TCs split the axis)."""
    n_tiles = pl.cdiv(B, tb_max)
    if B > 8:
        n_tiles = _round_up(max(n_tiles, 2), 2)
    tb = _round_up(pl.cdiv(B, n_tiles), 8)
    grid = pl.cdiv(B, tb)
    return tb, grid


def _resident_spec(block_shape):
    """Constant-index (VMEM-resident) spec; request single buffering since it
    never re-DMAs across the grid (saves 1x w1/w2 worth of VMEM)."""
    index_map = lambda i: (0, 0)
    try:
        return pl.BlockSpec(block_shape, index_map, pipeline_mode=pl.Buffered(1))
    except Exception:  # older jax without pipeline_mode / Buffered
        return pl.BlockSpec(block_shape, index_map)


# --------------------------------------------------------------------------
# Forward
# --------------------------------------------------------------------------
def generator_forward(x, padded_params, d_out, alpha=0.2, tb_max=256,
                      compute_dtype=jnp.bfloat16, out_dtype=jnp.bfloat16):
    """x: (B, D_in) f32; padded_params from prepare_generator_params.

    Returns (B, d_out) in `out_dtype`, matching torch:
        tanh(leaky_relu(x @ w1 + b1, alpha) @ w2 + b2)
    """
    w1_p, b1_p, w2_p, b2_p = padded_params
    B, D_in = x.shape
    D_in_p, H_p = w1_p.shape
    D_out_p = w2_p.shape[1]
    assert D_in <= D_in_p

    tb, grid = _choose_batch_tile(B, tb_max)
    B_p = tb * grid

    # Only the activations are padded/cast per call.
    x_p = jnp.zeros((B_p, D_in_p), compute_dtype).at[:B, :D_in].set(
        x.astype(compute_dtype))

    out_bytes = jnp.dtype(out_dtype).itemsize
    cost = pl.CostEstimate(
        flops=2 * B_p * (D_in_p * H_p + H_p * D_out_p),
        transcendentals=B_p * D_out_p,
        bytes_accessed=(B_p * D_in_p * 2 + D_in_p * H_p * 2 + H_p * 4
                        + H_p * D_out_p * 2 + D_out_p * 4
                        + B_p * D_out_p * out_bytes),
    )

    # VMEM budget: double-buffered x/out tiles, single-copy resident params,
    # plus f32 fc1/fc2 intermediates; 2x headroom for compiler internals.
    vmem_needed = (
        2 * tb * D_in_p * 2                       # x tiles (bf16, double-buffered)
        + 2 * tb * D_out_p * out_bytes            # out tiles (double-buffered)
        + D_in_p * H_p * 2 + H_p * D_out_p * 2    # resident weights (bf16)
        + (H_p + D_out_p) * 4                     # resident biases (f32)
        + tb * H_p * 4 + tb * D_out_p * 4)        # f32 intermediates
    vmem_limit = int(min(64 << 20, max(16 << 20, 2 * vmem_needed)))

    kernel = functools.partial(generator_kernel, alpha=alpha)

    out_p = pl.pallas_call(
        kernel,
        out_shape=jax.ShapeDtypeStruct((B_p, D_out_p), out_dtype),
        grid_spec=pl.GridSpec(
            grid=(grid,),
            in_specs=[
                pl.BlockSpec((tb, D_in_p), lambda i: (i, 0)),   # x tile (moves)
                _resident_spec((D_in_p, H_p)),                  # w1 resident
                _resident_spec((1, H_p)),                       # b1 resident
                _resident_spec((H_p, D_out_p)),                 # w2 resident
                _resident_spec((1, D_out_p)),                   # b2 resident
            ],
            out_specs=pl.BlockSpec((tb, D_out_p), lambda i: (i, 0)),
        ),
        compiler_params=pltpu.CompilerParams(
            dimension_semantics=("parallel",),
            vmem_limit_bytes=vmem_limit,
        ),
        cost_estimate=cost,
    )(x_p, w1_p, b1_p, w2_p, b2_p)

    return out_p[:B, :d_out]


def make_generator(w1, b1, w2, b2, alpha=0.2, out_dtype=jnp.bfloat16):
    """Pads/casts params once and returns a jitted forward over x."""
    padded_params, (_, _, d_out) = prepare_generator_params(w1, b1, w2, b2)

    @jax.jit
    def fwd(x):
        return generator_forward(x, padded_params, d_out,
                                 alpha=alpha, out_dtype=out_dtype)

    return fwd


def xavier_uniform(key, fan_in, fan_out, dtype=jnp.float32):
    # Matches torch.nn.init.xavier_uniform_ (gain=1).
    limit = jnp.sqrt(6.0 / (fan_in + fan_out))
    return jax.random.uniform(
        key, (fan_in, fan_out), dtype=dtype, minval=-limit, maxval=limit
    )


if __name__ == "__main__":
    # Small shapes consistent with the module (noise -> hidden -> image).
    # Deliberately non-128/8-aligned to exercise padding + slice-off.
    B, D_IN, N_HIDDEN, N_OUTPUT, ALPHA = 12, 16, 32, 72, 0.2

    key = jax.random.PRNGKey(0)
    k_x, k_w1, k_w2 = jax.random.split(key, 3)

    x = jax.random.normal(k_x, (B, D_IN), dtype=jnp.float32)
    # Weights stored as (in, out) = transpose of torch's (out, in) Linear weight.
    w1 = xavier_uniform(k_w1, D_IN, N_HIDDEN)
    b1 = jnp.zeros((N_HIDDEN,), dtype=jnp.float32)     # init.constant(bias, 0)
    w2 = xavier_uniform(k_w2, N_HIDDEN, N_OUTPUT)
    b2 = jnp.zeros((N_OUTPUT,), dtype=jnp.float32)

    generator = make_generator(w1, b1, w2, b2, alpha=ALPHA)  # params padded ONCE
    out = generator(x)
    jax.block_until_ready(out)
    assert out.shape == (B, N_OUTPUT)
    out_f32 = out.astype(jnp.float32)

    # Reference 1: bf16-matched math (same operand dtypes / f32 accumulation);
    # tolerance covers the bf16 output store.
    xc, w1c, w2c = (a.astype(jnp.bfloat16) for a in (x, w1, w2))
    h_ref = jnp.dot(xc, w1c, preferred_element_type=jnp.float32) + b1
    h_ref = jnp.maximum(h_ref, ALPHA * h_ref)
    y_ref = jnp.dot(h_ref.astype(jnp.bfloat16), w2c,
                    preferred_element_type=jnp.float32) + b2
    ref_bf16 = jnp.tanh(y_ref)
    assert jnp.allclose(out_f32, ref_bf16, atol=1e-2, rtol=1e-2)

    # Reference 2: pure-f32 math (loose tolerance for bf16 MXU operands/output).
    h32 = x @ w1 + b1
    h32 = jnp.where(h32 >= 0.0, h32, ALPHA * h32)
    ref_f32 = jnp.tanh(h32 @ w2 + b2)
    assert jnp.allclose(out_f32, ref_f32, atol=5e-2, rtol=5e-2)

    print("KERNEL_OK")
</pallas_src>

<mosaic_0001>
module attributes {stable_mosaic.version = 11 : i64} {
  func.func @generator_kernel(%arg0: i32, %arg1: memref<8x128xbf16, #tpu.memory_space<vmem>>, %arg2: memref<128x128xbf16, #tpu.memory_space<vmem>>, %arg3: memref<1x128xf32, #tpu.memory_space<vmem>>, %arg4: memref<128x128xbf16, #tpu.memory_space<vmem>>, %arg5: memref<1x128xf32, #tpu.memory_space<vmem>>, %arg6: memref<8x128xbf16, #tpu.memory_space<vmem>>) attributes {dimension_semantics = [#tpu.dimension_semantics<parallel>], iteration_bounds = array<i64: 2>, scalar_prefetch = 0 : i64, scratch_operands = 0 : i64, tpu.core_type = #tpu.core_type<tc>, window_params = [{transform_indices = @transform_0, window_bounds = array<i64: 8, 128>}, {pipeline_mode = #tpu.pipeline_mode<synchronous>, transform_indices = @transform_1, window_bounds = array<i64: 128, 128>}, {pipeline_mode = #tpu.pipeline_mode<synchronous>, transform_indices = @transform_2, window_bounds = array<i64: 1, 128>}, {pipeline_mode = #tpu.pipeline_mode<synchronous>, transform_indices = @transform_3, window_bounds = array<i64: 128, 128>}, {pipeline_mode = #tpu.pipeline_mode<synchronous>, transform_indices = @transform_4, window_bounds = array<i64: 1, 128>}, {transform_indices = @transform_5, window_bounds = array<i64: 8, 128>}]} {
    %c0 = arith.constant 0 : index
    %c0_0 = arith.constant 0 : index
    %0 = vector.load %arg1[%c0, %c0_0] : memref<8x128xbf16, #tpu.memory_space<vmem>>, vector<8x128xbf16>
    %c0_1 = arith.constant 0 : index
    %c0_2 = arith.constant 0 : index
    %1 = vector.load %arg2[%c0_1, %c0_2] : memref<128x128xbf16, #tpu.memory_space<vmem>>, vector<128x128xbf16>
    %cst = arith.constant dense<0.000000e+00> : vector<8x128xf32>
    %2 = tpu.matmul %0, %1, %cst {dimension_numbers = #tpu.dot_dimension_numbers<[1], [0], [0], [1], [0, 0, 1, 1], [], []>} : vector<8x128xbf16>, vector<128x128xbf16>, vector<8x128xf32> -> vector<8x128xf32>
    %c0_3 = arith.constant 0 : index
    %c0_4 = arith.constant 0 : index
    %3 = vector.load %arg3[%c0_3, %c0_4] : memref<1x128xf32, #tpu.memory_space<vmem>>, vector<1x128xf32>
    %4 = vector.broadcast %3 : vector<1x128xf32> to vector<8x128xf32>
    %5 = arith.addf %2, %4 : vector<8x128xf32>
    %cst_5 = arith.constant 2.000000e-01 : f32
    %6 = vector.broadcast %cst_5 : f32 to vector<8x128xf32>
    %7 = arith.mulf %6, %5 : vector<8x128xf32>
    %8 = arith.maximumf %5, %7 : vector<8x128xf32>
    %9 = arith.truncf %8 : vector<8x128xf32> to vector<8x128xbf16>
    %c0_6 = arith.constant 0 : index
    %c0_7 = arith.constant 0 : index
    %10 = vector.load %arg4[%c0_6, %c0_7] : memref<128x128xbf16, #tpu.memory_space<vmem>>, vector<128x128xbf16>
    %cst_8 = arith.constant dense<0.000000e+00> : vector<8x128xf32>
    %11 = tpu.matmul %9, %10, %cst_8 {dimension_numbers = #tpu.dot_dimension_numbers<[1], [0], [0], [1], [0, 0, 1, 1], [], []>} : vector<8x128xbf16>, vector<128x128xbf16>, vector<8x128xf32> -> vector<8x128xf32>
    %c0_9 = arith.constant 0 : index
    %c0_10 = arith.constant 0 : index
    %12 = vector.load %arg5[%c0_9, %c0_10] : memref<1x128xf32, #tpu.memory_space<vmem>>, vector<1x128xf32>
    %13 = vector.broadcast %12 : vector<1x128xf32> to vector<8x128xf32>
    %14 = arith.addf %11, %13 : vector<8x128xf32>
    %15 = math.tanh %14 : vector<8x128xf32>
    %16 = arith.truncf %15 : vector<8x128xf32> to vector<8x128xbf16>
    %c0_11 = arith.constant 0 : index
    %c0_12 = arith.constant 0 : index
    %17 = vector.load %arg6[%c0_11, %c0_12] : memref<8x128xbf16, #tpu.memory_space<vmem>>, vector<8x128xbf16>
    tpu.vector_store %arg6[%c0_11, %c0_12], %16 {strides = array<i32>} : memref<8x128xbf16, #tpu.memory_space<vmem>>, vector<8x128xbf16>,
    return
  }
  func.func @transform_0(%arg0: i32) -> (i32, i32) {
    %c0_i32 = arith.constant 0 : i32
    %c0_i32_0 = arith.constant 0 : i32
    return %arg0, %c0_i32 : i32, i32
  }
  func.func @transform_1(%arg0: i32) -> (i32, i32) {
    %c0_i32 = arith.constant 0 : i32
    %c0_i32_0 = arith.constant 0 : i32
    %c0_i32_1 = arith.constant 0 : i32
    return %c0_i32, %c0_i32_0 : i32, i32
  }
  func.func @transform_2(%arg0: i32) -> (i32, i32) {
    %c0_i32 = arith.constant 0 : i32
    %c0_i32_0 = arith.constant 0 : i32
    %c0_i32_1 = arith.constant 0 : i32
    return %c0_i32, %c0_i32_0 : i32, i32
  }
  func.func @transform_3(%arg0: i32) -> (i32, i32) {
    %c0_i32 = arith.constant 0 : i32
    %c0_i32_0 = arith.constant 0 : i32
    %c0_i32_1 = arith.constant 0 : i32
    return %c0_i32, %c0_i32_0 : i32, i32
  }
  func.func @transform_4(%arg0: i32) -> (i32, i32) {
    %c0_i32 = arith.constant 0 : i32
    %c0_i32_0 = arith.constant 0 : i32
    %c0_i32_1 = arith.constant 0 : i32
    return %c0_i32, %c0_i32_0 : i32, i32
  }
  func.func @transform_5(%arg0: i32) -> (i32, i32) {
    %c0_i32 = arith.constant 0 : i32
    %c0_i32_0 = arith.constant 0 : i32
    return %arg0, %c0_i32 : i32, i32
  }
}

</mosaic_0001>

<bundles_post_ra>
// kernel: fwd.1
= control target key start
LH: loop header
LB: loop body
LE: loop exit
PB: predicated region body
PF: predicated region fallthrough
CT: control target
= control target key end

     0   :  { %10 = vsyncpa [#allocation3], 0  ;;  %s962_s0 = inlined_call_operand.vmem [shape: bf16[16,128], index: 0, kind: input, shape index: {}]   ;;  %s963_s1 = inlined_call_operand.hbm [shape: bf16[128,128], index: 1, kind: input, shape index: {}]   ;;  %s964_s2 = inlined_call_operand.vmem [shape: f32[1,128], index: 2, kind: input, shape index: {}, may-alias: {2,4}]   ;;  %s965_s3 = inlined_call_operand.hbm [shape: bf16[128,128], index: 3, kind: input, shape index: {}]   ;;  %s966_s4 = inlined_call_operand.vmem [shape: f32[1,128], index: 4, kind: input, shape index: {}, may-alias: {2,4}]   ;;  %s967_s5 = inlined_call_operand.hbm [shape: bf16[16,128], index: 5, kind: output, shape index: {}]  }
   0x1   :  { %11 = vsyncpa [#allocation6], 0 }
   0x2   :  { %12 = vsyncpa [#allocation4], 0 }
   0x3   :  { %14 = vsyncpa [#allocation4 + $0x1], 0  ;;  %s846_s18 = smov 0   ;;  %s848_s19 = smov 0  }
   0x4   :  { %s850_s20 = smov 0   ;;  %s852_s21 = smov 0  }
   0x5 LB: > { %s867_s22 = sadd.s32 4294967295, %s810_s21   ;;  %s520_s23 = sadd.s32 4294967294, %s810_s21   ;;  %s810_s21 = sphi %s852_s21, %s974_s21   ;;  %s806_s20 = sphi %s850_s20, %s973_s20   ;;  %s802_s19 = sphi %s848_s19, %s972_s19   ;;  %s798_s18 = sphi %s846_s18, %s971_s18  }
   0x6   : > { %s871_s24 = sadd.s32 1, %s810_s21   ;;  %s137_s25 = sadd.s32 1, %s806_s20 }
   0x7   : > { %s134_s26 = ssub.s32 %s810_s21, %s871_s24  ;;  %p147_p0 = scmp.ne.s32.totalorder %s806_s20, %s802_s19 }
   0x8   : > { %p135_p1 = scmp.eq.s32.totalorder %s134_s26, 0  ;;  %p148_p2 = scmp.eq.s32.totalorder %s867_s22, 1 }
   0x9   : > { %p153_p3 = scmp.ne.s32.totalorder %s802_s19, %s798_s18  ;;  %p154_p4 = scmp.eq.s32.totalorder %s520_s23, 1 }
   0xa   : > { %s882_s27 = scalar_select %p135_p1, %s806_s20, %s137_s25  }
   0xb   : > { %p884_p5 = por %p148_p2, %p147_p0  ;;  %p888_p6 = por %p154_p4, %p153_p3 }
   0xc   : > { %p521_p7 = scmp.ge.s32.totalorder %s810_s21, 1  ;;  %p161_p8 = scmp.lt.s32.totalorder %s810_s21, 3 }
   0xd   : > { %p635_p9 = scmp.eq.s32.totalorder %s867_s22, 0  ;;  %s172_s8 = sshll.u32 %s963_s1, 4  ;;  %s173_s8 = int_to_ptr.hbm [resolvable:$true] %s172_s8 }
   0xe   : > { %p895_p10 = pnand %p521_p7, %p161_p8  ;;  %s812_s9 = smov [#allocation2]  }
   0xf   : > { %s174_s10 = sshll.u32 %s812_s9, 4  ;;  %s189_s13 = sshll.u32 %s965_s3, 4  ;;  %s175_s10 = int_to_ptr.vmem [resolvable:$true] %s174_s10  ;;  %s190_s13 = int_to_ptr.hbm [resolvable:$true] %s189_s13 }
  0x10   : > { %p624_p11 = pneg %p895_p10  ;;  %s813_s14 = smov 64  }
  0x11   : > { %s814_s15 = smov 4   ;;  %s815_s16 = smov [#allocation5]  }
  0x12   : > { %p625_p12 = pnand %p635_p9, %p624_p11  ;;  %s191_s17 = sshll.u32 %s815_s16, 4  ;;  %s192_s17 = int_to_ptr.vmem [resolvable:$true] %s191_s17 }
  0x13   : > { %217 = sbr.rel (%p895_p10) target bundleno = 333 (0x14d), region = 40 }
  0x14   : > { %627 = dma.hbm_to_vmem [thread:$0]  (!%p625_p12), %s173_s8, 1024, %s175_s10, [#allocation3], %s813_s14, %s813_s14, %s814_s15  }
  0x15   : > { %630 = dma.hbm_to_vmem [thread:$0]  (!%p625_p12), %s190_s13, 1024, %s192_s17, [#allocation6], %s813_s14, %s813_s14, %s814_s15  }
  0x18   : > { %785 = dma.done.wait (%p635_p9), [#allocation3], 1024  }
  0x19   : > { %787 = vsyncadd (%p635_p9), [#allocation3], 4294966272 }
  0x1a   : > { %789 = dma.done.wait (%p635_p9), [#allocation6], 1024  }
  0x1b   : > { %791 = vsyncadd (%p635_p9), [#allocation6], 4294966272  ;;  %v605_v0 = vld [vmem:[#allocation2 + $0x38] sm:$0xff]  ;;  %v604_v1 = vld [vmem:[#allocation2 + $0x30] sm:$0xff]  ;;  %p250_p13 = scmp.lt.s32.totalorder %s867_s22, 1  ;;  %s247_s11 = sand.u32 1, %s802_s19  }
  0x1c   : > { %323 = vmatpush.bf16.msra.mxu0 %v605_v0  ;;  %v613_v2 = vld [vmem:[#allocation5 + $0x38] sm:$0xff]  ;;  %v612_v3 = vld [vmem:[#allocation5 + $0x30] sm:$0xff]  ;;  %v603_v4 = vld [vmem:[#allocation2 + $0x28] sm:$0xff]  ;;  %s528_s12 = sshll.u32 %s247_s11, 2  ;;  %s595_s13 = sshll.u32 %s867_s22, 2 }
  0x1d   : > { %407 = vmatpush.bf16.msra.mxu1 %v613_v2  ;;  %v611_v5 = vld [vmem:[#allocation5 + $0x28] sm:$0xff]  ;;  %v602_v6 = vld [vmem:[#allocation2 + $0x20] sm:$0xff]  ;;  %v601_v8 = vld [vmem:[#allocation2 + $0x18] sm:$0xff]  ;;  %s251_s23 = scalar_select %p250_p13, %s867_s22, 1 }
  0x1e   : > { %v610_v7 = vld [vmem:[#allocation5 + $0x20] sm:$0xff]  ;;  %v609_v9 = vld [vmem:[#allocation5 + $0x18] sm:$0xff]  ;;  %v600_v10 = vld [vmem:[#allocation2 + $0x10] sm:$0xff]  ;;  %s434_s16 = scalar_lea.hbm %s967_s5, %s595_s13  ;;  %s249_s17 = scalar_lea.vmem [#allocation7], %s528_s12 }
  0x1f   : > { %v608_v11 = vld [vmem:[#allocation5 + $0x10] sm:$0xff]  ;;  %v599_v12 = vld [vmem:[#allocation2 + $0x8] sm:$0xff]  ;;  %s529_s25 = sshll.u32 %s251_s23, 2  ;;  %v598_v13 = vld [vmem:[#allocation2] sm:$0xff]  ;;  %s436_s23 = sshll.u32 %s249_s17, 4  ;;  %s437_s23 = int_to_ptr.vmem [resolvable:$true] %s436_s23 }
  0x20   : > { %324 = vmatpush.bf16.msra.mxu0 %v604_v1  ;;  %s253_s6 = scalar_lea.vmem %s962_s0, %s529_s25  ;;  %v607_v15 = vld [vmem:[#allocation5 + $0x8] sm:$0xff]  ;;  %v606_v16 = vld [vmem:[#allocation5] sm:$0xff]  ;;  %s438_s25 = sshll.u32 %s434_s16, 4  ;;  %s439_s25 = int_to_ptr.hbm [resolvable:$true] %s438_s25 }
  0x21   : > { %408 = vmatpush.bf16.msra.mxu1 %v612_v3  ;;  %v254_v14 = vld [vmem:[%s253_s6] sm:$0xf]  ;;  %s424_s26 = scalar_lea.sflag [#allocation4], %s247_s11  ;;  %s754_s30 = sshra.s32 %s439_s25, 4  ;;  %s755_s30 = int_to_ptr.hbm [resolvable:$true] %s754_s30 }
  0x22   : > { %v676_v17 = vld [vmem:[%s964_s2] ss:$0 sm:$0xff]  ;;  %s756_s6 = scalar_lea.hbm %s755_s30, 4  ;;  %s760_s8 = scalar_lea.hbm %s967_s5, 8 }
  0x23   : > { %v677_v24 = vld [vmem:[%s966_s4] ss:$0 sm:$0xff]  ;;  %p757_p0 = scmp.ne.s32.totalorder %s755_s30, %s756_s6  ;;  %p761_p3 = scmp.lt.s32.totalorder %s755_s30, %s967_s5 }
  0x24   : > { %325 = vmatpush.bf16.msra.mxu0 %v603_v4  ;;  %p762_p4 = scmp.lt.s32.totalorder %s760_s8, %s756_s6 }
  0x25   : > { %409 = vmatpush.bf16.msra.mxu1 %v611_v5  ;;  %p758_p1 = pnand %p757_p0, %p884_p5 }
  0x26   : > { %p763_p7 = por %p762_p4, %p761_p3 }
  0x27   : > { %p759_p2 = pneg %p758_p1 }
  0x28   : > { %326 = vmatpush.bf16.msra.mxu0 %v602_v6 }
  0x29   : > { %410 = vmatpush.bf16.msra.mxu1 %v610_v7  ;;  %p764_p8 = pnand %p763_p7, %p759_p2 }
  0x2c   : > { %327 = vmatpush.bf16.msra.mxu0 %v601_v8 }
  0x2d   : > { %411 = vmatpush.bf16.msra.mxu1 %v609_v9 }
  0x30   : > { %328 = vmatpush.bf16.msra.mxu0 %v600_v10 }
  0x31   : > { %412 = vmatpush.bf16.msra.mxu1 %v608_v11 }
  0x34   : > { %329 = vmatpush.bf16.msra.mxu0 %v599_v12 }
  0x35   : > { %413 = vmatpush.bf16.msra.mxu1 %v607_v15 }
  0x38   : > { %330 = vmatpush.bf16.msra.mxu0 %v598_v13 }
  0x39   : > { %414 = vmatpush.bf16.msra.mxu1 %v606_v16 }
  0x3b   : > { %331 = vmatmul.bf16.vlgmr.msra.gmra.mxu0 %v254_v14 }
  0xb8   : > { %v332_v18 = vpop.f32.mrf.mxu0 }
  0xb9   : > { %v333_v19 = vadd.f32 %v676_v17, %v332_v18 }
  0xbb   : > { %v336_v20 = vmul.f32 0.2, %v333_v19 }
  0xbd   : > { %v337_v21 = vmax.f32 %v333_v19, %v336_v20 }
  0xbf   : > { %v338_v22 = vpack.c.bf16 %v337_v21, %v337_v21 }
  0xc0   : > { %v334_v23 = vpop.f32.mrf.mxu0 }
  0xc1   : > { %415 = vmatmul.bf16.vlgmr.msra.gmra.mxu1 %v338_v22 }
 0x13e   : > { %v416_v25 = vpop.f32.mrf.mxu1 }
 0x13f   : > { %v417_v26 = vadd.f32 %v677_v24, %v416_v25 }
 0x141   : > { %678 = vtanh.f32 %v417_v26 }
 0x146   : > { %v418_v27 = vpop.f32.mrf.mxu1 }
 0x147   : > { %v679_v28 = vpop.eup %678 }
 0x148   : > { %v421_v29 = vpack.c.bf16 %v679_v28, %v679_v28 }
 0x14a   : > { %422 = vst [vmem:[%s249_s17] sm:$0xf] %v421_v29 }
 0x14b   : > { %767 = shalt.err (!%p764_p8)
}
 0x14c   : > { %622 = dma.vmem_to_hbm [thread:$0]  (%p884_p5), %s437_s23, 64, %s439_s25, %s424_s26  }
 0x14d PF: > { %p639_p9 = scmp.ge.s32.totalorder %s810_s21, 2  ;;  %s450_s11 = sand.u32 1, %s798_s18  }
 0x14e   : > { %s451_s12 = scalar_lea.sflag [#allocation4], %s450_s11 }
 0x14f   : > { %p632_p10 = pnand %p639_p9, %p888_p6 }
 0x151   : > { %p633_p11 = pneg %p632_p10 }
 0x153   : > { %793 = dma.done.wait (%p633_p11), %s451_s12, 64  }
 0x154   : > { %795 = vsyncadd (%p633_p11), %s451_s12, 4294967232  ;;  %p17_p12 = scmp.ge.s32.totalorder %s871_s24, 4   ;;  %s971_s18 = smov %s802_s19 }
 0x155   : > { %s972_s19 = smov %s806_s20  ;;  %s973_s20 = smov %s882_s27 }
 0x156   : > { %s974_s21 = smov %s871_s24  ;;  %19 = sbr.rel (!%p17_p12) target bundleno = 5 (0x5), region = 84 }
 0x15b   :  { %457 = vsyncpa [#allocation3], 1 }
 0x15c   :  { %459 = vsyncpa [#allocation3 + $0x1], 1 }
 0x15d   :  { %460 = vsyncpa [#allocation6], 1 }
 0x15e   :  { %461 = vsyncpa [#allocation4], 1 }
 0x15f   :  { %463 = vsyncpa [#allocation4 + $0x1], 1 }

</bundles_post_ra>
